<compile_context>
chip_gen: v7x
topology: tpu7x:2x2x1
jax: 0.10.0
libtpu: 0.0.40
codegen_flags: <defaults>
</compile_context>

<pallas_src>
import functools

import jax
import jax.numpy as jnp
from jax.experimental import pallas as pl
from jax.experimental.pallas import tpu as pltpu


def _se_fused_kernel(x_ref, w1t_ref, b1_ref, w2t_ref, b2_ref,
                     o_ref, acc_ref, gate_ref, *,
                     inv_n, c, fold, rows_total, tile_rows, ragged):
    phase = pl.program_id(0)          # 0: reduce + gate, 1: scale
    i = pl.program_id(1)              # row-tile index
    n_tiles = pl.num_programs(1)

    @pl.when(jnp.logical_and(phase == 0, i == 0))
    def _init():
        acc_ref[...] = jnp.zeros_like(acc_ref)

    @pl.when(phase == 0)
    def _accumulate():
        xt = x_ref[...]
        if ragged:
            # Mask garbage rows of the (possibly partial) last tile; zeros do
            # not perturb the sum and inv_n uses the true N.
            ridx = jax.lax.broadcasted_iota(jnp.int32, xt.shape, 0) + i * tile_rows
            xt = jnp.where(ridx < rows_total, xt, jnp.zeros_like(xt))
        # Lane-dense per-lane column sums of this (tile_rows, fold*C) tile,
        # accumulated in f32 (accumulation dtype only; no full f32 tile copy).
        acc_ref[...] += jnp.sum(xt, axis=0, keepdims=True, dtype=jnp.float32)

    @pl.when(jnp.logical_and(phase == 0, i == n_tiles - 1))
    def _gate():
        acc = acc_ref[...]                               # (1, fold*C) f32
        # Combine the fold groups (lanes -> channels) once with exact f32 adds.
        branch = acc[:, 0:c]
        for j in range(1, fold):
            branch = branch + acc[:, j * c:(j + 1) * c]
        branch = branch * inv_n                          # (1, C) mean over N
        h = jnp.dot(branch, w1t_ref[...],
                    preferred_element_type=jnp.float32) + b1_ref[...]
        h = jnp.maximum(h, 0.0)                          # ReLU
        z = jnp.dot(h, w2t_ref[...],
                    preferred_element_type=jnp.float32) + b2_ref[...]
        # Numerically stable sigmoid (exp of non-positive arg only; no inf).
        ez = jnp.exp(-jnp.abs(z))
        gate = jnp.where(z >= 0.0, 1.0 / (1.0 + ez), ez / (1.0 + ez))
        if fold > 1:
            # Lane-tile the gate so phase 1 broadcasts it over the folded
            # (rows, fold*C) view without per-step shuffling.
            gate = jnp.concatenate([gate] * fold, axis=-1)   # (1, fold*C)
        gate_ref[...] = gate                                  # keep f32

    @pl.when(phase == 1)
    def _scale():
        # Multiply in f32 (gate precision), cast the product to the out dtype.
        o_ref[...] = (x_ref[...].astype(jnp.float32) * gate_ref[...]
                      ).astype(o_ref.dtype)


def prepare_params(w1, b1, w2, b2):
    """One-time conversion of PyTorch Linear params to kernel layout.

    PyTorch stores Linear weights as (out, in); the kernel consumes (in, out)
    and row-shaped biases, so no per-call transpose lands in the hot path.
    """
    c = w1.shape[0]
    return w1.T, b1.reshape(1, c), w2.T, b2.reshape(1, c)


@functools.partial(jax.jit, static_argnames=("max_tile_rows",))
def se_block(x, w1t, b1r, w2t, b2r, *, max_tile_rows=None):
    """x: (N, C); w1t, w2t: (C, C) in (in, out) layout; b1r, b2r: (1, C)."""
    N, C = x.shape
    dt = x.dtype
    itemsize = jnp.dtype(dt).itemsize

    # Lane-dense fold: view (N, C) as (N//fold, fold*C) so BOTH phases run on
    # 128-lane-dense tiles (free row-major view; no pad / copy). C=32 -> 4.
    fold = 1
    if C < 128 and 128 % C == 0 and N % (128 // C) == 0:
        fold = 128 // C
    lanes = fold * C
    rows = N // fold
    x_v = x.reshape(rows, lanes) if fold > 1 else x

    # Row-tile sizing (in folded rows).
    sub = max(1, (8 * 4) // itemsize)             # 8 rows f32 / 16 bf16 sublane
    bytes_per_row = lanes * itemsize
    resident_rows = (8 << 20) // bytes_per_row    # keep x resident up to ~8 MiB
    stream_rows = max(sub, ((4 << 20) // bytes_per_row) // sub * sub)
    if max_tile_rows is not None:                 # test / tuning knob
        resident_rows = 0
        stream_rows = max(sub, (max_tile_rows // sub) * sub)
    if rows <= max(resident_rows, stream_rows):
        tr = rows                                 # single resident tile
    else:
        tr = stream_rows                          # ~4 MiB streaming tiles
    n_tiles = pl.cdiv(rows, tr)
    ragged = (rows % tr) != 0                     # handled in-kernel, no jnp.pad

    tile_bytes = tr * lanes * itemsize
    # in + out double-buffered plus small residents; capped for v7x headroom.
    vmem_limit = int(min(48 << 20, max(32 << 20, 5 * tile_bytes + (2 << 20))))

    kernel = functools.partial(
        _se_fused_kernel, inv_n=1.0 / N, c=C, fold=fold,
        rows_total=rows, tile_rows=tr, ragged=ragged)

    out_v = pl.pallas_call(
        kernel,
        out_shape=jax.ShapeDtypeStruct((rows, lanes), dt),
        grid=(2, n_tiles),                         # (phase, row tile)
        in_specs=[
            pl.BlockSpec((tr, lanes), lambda p, i: (i, 0)),   # x tiles (both phases)
            pl.BlockSpec((C, C), lambda p, i: (0, 0)),        # W1^T  (resident)
            pl.BlockSpec((1, C), lambda p, i: (0, 0)),        # b1    (resident)
            pl.BlockSpec((C, C), lambda p, i: (0, 0)),        # W2^T  (resident)
            pl.BlockSpec((1, C), lambda p, i: (0, 0)),        # b2    (resident)
        ],
        # Phase 0 never writes the output: pin its block index to 0 so no
        # garbage block is ever written back; phase 1 walks the row tiles.
        out_specs=pl.BlockSpec((tr, lanes), lambda p, i: (i * p, 0)),
        scratch_shapes=[
            pltpu.VMEM((1, lanes), jnp.float32),   # per-lane column sums (f32)
            pltpu.VMEM((1, lanes), jnp.float32),   # gate, fold-replicated (f32)
        ],
        compiler_params=pltpu.CompilerParams(
            dimension_semantics=("arbitrary", "arbitrary"),
            vmem_limit_bytes=vmem_limit),
    )(x_v, w1t, b1r, w2t, b2r)

    return out_v.reshape(N, C) if fold > 1 else out_v


def se_block_ref(x, w1, b1, w2, b2):
    """Pure-JAX reference (PyTorch-layout weights)."""
    branch = jnp.mean(x, axis=0, keepdims=True)
    h = jnp.maximum(branch @ w1.T + b1, 0.0)
    gate = jax.nn.sigmoid(h @ w2.T + b2)
    return gate * x


if __name__ == "__main__":
    key = jax.random.PRNGKey(0)
    kx, k1, k2, k3, k4, kx2, kx3, kx4 = jax.random.split(key, 8)

    C = 32  # channel axis
    bound = 1.0 / jnp.sqrt(C)
    # PyTorch Linear shapes: weight (out, in), bias (out,).
    w1 = jax.random.uniform(k1, (C, C), jnp.float32, -bound, bound)
    b1 = jax.random.uniform(k2, (C,), jnp.float32, -bound, bound)
    w2 = jax.random.uniform(k3, (C, C), jnp.float32, -bound, bound)
    b2 = jax.random.uniform(k4, (C,), jnp.float32, -bound, bound)

    # One-time layout prep, outside the jitted hot path.
    w1t, b1r, w2t, b2r = prepare_params(w1, b1, w2, b2)

    # Nominal small shape implied by the module: 8 nodes x 32 channels
    # (single resident tile -> one HBM read + one write).
    x = jax.random.normal(kx, (8, C), dtype=jnp.float32)
    out = jax.block_until_ready(se_block(x, w1t, b1r, w2t, b2r))
    ref = se_block_ref(x, w1, b1, w2, b2)
    assert out.shape == x.shape and out.dtype == x.dtype
    assert jnp.allclose(out, ref, atol=1e-5, rtol=1e-5)

    # Multi-tile streaming path (folded, aligned tiles, both grid phases).
    x2 = jax.random.normal(kx2, (512, C), dtype=jnp.float32)
    out2 = jax.block_until_ready(
        se_block(x2, w1t, b1r, w2t, b2r, max_tile_rows=64))
    assert jnp.allclose(out2, se_block_ref(x2, w1, b1, w2, b2),
                        atol=1e-5, rtol=1e-5)

    # Ragged folded last tile -> in-kernel masking path (no jnp.pad).
    x3 = jax.random.normal(kx3, (500, C), dtype=jnp.float32)
    out3 = jax.block_until_ready(
        se_block(x3, w1t, b1r, w2t, b2r, max_tile_rows=16))
    assert jnp.allclose(out3, se_block_ref(x3, w1, b1, w2, b2),
                        atol=1e-5, rtol=1e-5)

    # N not divisible by the fold factor -> unfolded fallback, ragged tile.
    x4 = jax.random.normal(kx4, (509, C), dtype=jnp.float32)
    out4 = jax.block_until_ready(
        se_block(x4, w1t, b1r, w2t, b2r, max_tile_rows=64))
    assert jnp.allclose(out4, se_block_ref(x4, w1, b1, w2, b2),
                        atol=1e-5, rtol=1e-5)

    print("KERNEL_OK")
</pallas_src>

<mosaic_0001>
module attributes {stable_mosaic.version = 11 : i64} {
  func.func @_se_fused_kernel(%arg0: i32, %arg1: i32, %arg2: memref<2x128xf32, #tpu.memory_space<vmem>>, %arg3: memref<32x32xf32, #tpu.memory_space<vmem>>, %arg4: memref<1x32xf32, #tpu.memory_space<vmem>>, %arg5: memref<32x32xf32, #tpu.memory_space<vmem>>, %arg6: memref<1x32xf32, #tpu.memory_space<vmem>>, %arg7: memref<2x128xf32, #tpu.memory_space<vmem>>, %arg8: memref<1x128xf32, #tpu.memory_space<vmem>>, %arg9: memref<1x128xf32, #tpu.memory_space<vmem>>) attributes {dimension_semantics = [#tpu.dimension_semantics<arbitrary>, #tpu.dimension_semantics<arbitrary>], iteration_bounds = array<i64: 2, 1>, scalar_prefetch = 0 : i64, scratch_operands = 2 : i64, tpu.core_type = #tpu.core_type<tc>, window_params = [{transform_indices = @transform_0, window_bounds = array<i64: 2, 128>}, {pipeline_mode = #tpu.pipeline_mode<synchronous>, transform_indices = @transform_1, window_bounds = array<i64: 32, 32>}, {pipeline_mode = #tpu.pipeline_mode<synchronous>, transform_indices = @transform_2, window_bounds = array<i64: 1, 32>}, {pipeline_mode = #tpu.pipeline_mode<synchronous>, transform_indices = @transform_3, window_bounds = array<i64: 32, 32>}, {pipeline_mode = #tpu.pipeline_mode<synchronous>, transform_indices = @transform_4, window_bounds = array<i64: 1, 32>}, {transform_indices = @transform_5, window_bounds = array<i64: 2, 128>}]} {
    %c0_i32 = arith.constant 0 : i32
    %0 = arith.cmpi eq, %arg0, %c0_i32 : i32
    %c0_i32_0 = arith.constant 0 : i32
    %1 = arith.cmpi eq, %arg1, %c0_i32_0 : i32
    %2 = arith.andi %0, %1 : i1
    %3 = arith.extui %2 : i1 to i32
    %c0_i32_1 = arith.constant 0 : i32
    %4 = arith.cmpi ne, %3, %c0_i32_1 : i32
    scf.if %4 {
      %cst = arith.constant 0.000000e+00 : f32
      %16 = vector.broadcast %cst : f32 to vector<1x128xf32>
      %c0 = arith.constant 0 : index
      %c0_8 = arith.constant 0 : index
      %17 = vector.load %arg8[%c0, %c0_8] : memref<1x128xf32, #tpu.memory_space<vmem>>, vector<1x128xf32>
      tpu.vector_store %arg8[%c0, %c0_8], %16 {strides = array<i32>} : memref<1x128xf32, #tpu.memory_space<vmem>>, vector<1x128xf32>,
    } else {
    }
    %c0_i32_2 = arith.constant 0 : i32
    %5 = arith.cmpi eq, %arg0, %c0_i32_2 : i32
    %6 = arith.extui %5 : i1 to i32
    %c0_i32_3 = arith.constant 0 : i32
    %7 = arith.cmpi ne, %6, %c0_i32_3 : i32
    scf.if %7 {
      %c0 = arith.constant 0 : index
      %c0_8 = arith.constant 0 : index
      %16 = vector.load %arg2[%c0, %c0_8] : memref<2x128xf32, #tpu.memory_space<vmem>>, vector<2x128xf32>
      %c0_9 = arith.constant 0 : index
      %c0_10 = arith.constant 0 : index
      %17 = vector.load %arg8[%c0_9, %c0_10] : memref<1x128xf32, #tpu.memory_space<vmem>>, vector<1x128xf32>
      %cst = arith.constant dense<0.000000e+00> : vector<128xf32>
      %18 = vector.multi_reduction <add>, %16, %cst [0] : vector<2x128xf32> to vector<128xf32>
      %19 = vector.shape_cast %18 : vector<128xf32> to vector<1x128xf32>
      %20 = arith.addf %17, %19 : vector<1x128xf32>
      %c0_11 = arith.constant 0 : index
      %c0_12 = arith.constant 0 : index
      %21 = vector.load %arg8[%c0_11, %c0_12] : memref<1x128xf32, #tpu.memory_space<vmem>>, vector<1x128xf32>
      tpu.vector_store %arg8[%c0_11, %c0_12], %20 {strides = array<i32>} : memref<1x128xf32, #tpu.memory_space<vmem>>, vector<1x128xf32>,
    } else {
    }
    %c0_i32_4 = arith.constant 0 : i32
    %8 = arith.cmpi eq, %arg0, %c0_i32_4 : i32
    %c0_i32_5 = arith.constant 0 : i32
    %9 = arith.cmpi eq, %arg1, %c0_i32_5 : i32
    %10 = arith.andi %8, %9 : i1
    %11 = arith.extui %10 : i1 to i32
    %c0_i32_6 = arith.constant 0 : i32
    %12 = arith.cmpi ne, %11, %c0_i32_6 : i32
    scf.if %12 {
      %c0 = arith.constant 0 : index
      %c0_8 = arith.constant 0 : index
      %16 = vector.load %arg8[%c0, %c0_8] : memref<1x128xf32, #tpu.memory_space<vmem>>, vector<1x128xf32>
      %17 = vector.extract_strided_slice %16 {offsets = [0, 0], sizes = [1, 32], strides = [1, 1]} : vector<1x128xf32> to vector<1x32xf32>
      %18 = vector.extract_strided_slice %16 {offsets = [0, 32], sizes = [1, 32], strides = [1, 1]} : vector<1x128xf32> to vector<1x32xf32>
      %19 = arith.addf %17, %18 : vector<1x32xf32>
      %20 = vector.extract_strided_slice %16 {offsets = [0, 64], sizes = [1, 32], strides = [1, 1]} : vector<1x128xf32> to vector<1x32xf32>
      %21 = arith.addf %19, %20 : vector<1x32xf32>
      %22 = vector.extract_strided_slice %16 {offsets = [0, 96], sizes = [1, 32], strides = [1, 1]} : vector<1x128xf32> to vector<1x32xf32>
      %23 = arith.addf %21, %22 : vector<1x32xf32>
      %cst = arith.constant 1.250000e-01 : f32
      %24 = vector.broadcast %cst : f32 to vector<1x32xf32>
      %25 = arith.mulf %23, %24 : vector<1x32xf32>
      %c0_9 = arith.constant 0 : index
      %c0_10 = arith.constant 0 : index
      %26 = vector.load %arg3[%c0_9, %c0_10] : memref<32x32xf32, #tpu.memory_space<vmem>>, vector<32x32xf32>
      %cst_11 = arith.constant dense<0.000000e+00> : vector<1x32xf32>
      %27 = tpu.matmul %25, %26, %cst_11 {dimension_numbers = #tpu.dot_dimension_numbers<[1], [0], [0], [1], [0, 0, 1, 1], [], []>} : vector<1x32xf32>, vector<32x32xf32>, vector<1x32xf32> -> vector<1x32xf32>
      %c0_12 = arith.constant 0 : index
      %c0_13 = arith.constant 0 : index
      %28 = vector.load %arg4[%c0_12, %c0_13] : memref<1x32xf32, #tpu.memory_space<vmem>>, vector<1x32xf32>
      %29 = arith.addf %27, %28 : vector<1x32xf32>
      %cst_14 = arith.constant 0.000000e+00 : f32
      %30 = vector.broadcast %cst_14 : f32 to vector<1x32xf32>
      %31 = arith.maximumf %29, %30 : vector<1x32xf32>
      %c0_15 = arith.constant 0 : index
      %c0_16 = arith.constant 0 : index
      %32 = vector.load %arg5[%c0_15, %c0_16] : memref<32x32xf32, #tpu.memory_space<vmem>>, vector<32x32xf32>
      %cst_17 = arith.constant dense<0.000000e+00> : vector<1x32xf32>
      %33 = tpu.matmul %31, %32, %cst_17 {dimension_numbers = #tpu.dot_dimension_numbers<[1], [0], [0], [1], [0, 0, 1, 1], [], []>} : vector<1x32xf32>, vector<32x32xf32>, vector<1x32xf32> -> vector<1x32xf32>
      %c0_18 = arith.constant 0 : index
      %c0_19 = arith.constant 0 : index
      %34 = vector.load %arg6[%c0_18, %c0_19] : memref<1x32xf32, #tpu.memory_space<vmem>>, vector<1x32xf32>
      %35 = arith.addf %33, %34 : vector<1x32xf32>
      %36 = math.absf %35 : vector<1x32xf32>
      %cst_20 = arith.constant 0.000000e+00 : f32
      %37 = vector.broadcast %cst_20 : f32 to vector<1x32xf32>
      %38 = arith.subf %37, %36 : vector<1x32xf32>
      %39 = math.exp %38 : vector<1x32xf32>
      %cst_21 = arith.constant 0.000000e+00 : f32
      %40 = vector.broadcast %cst_21 : f32 to vector<1x32xf32>
      %41 = arith.cmpf oge, %35, %40 : vector<1x32xf32>
      %cst_22 = arith.constant 1.000000e+00 : f32
      %42 = vector.broadcast %cst_22 : f32 to vector<1x32xf32>
      %43 = arith.addf %42, %39 : vector<1x32xf32>
      %cst_23 = arith.constant 1.000000e+00 : f32
      %44 = vector.broadcast %cst_23 : f32 to vector<1x32xf32>
      %45 = arith.divf %44, %43 : vector<1x32xf32>
      %cst_24 = arith.constant 1.000000e+00 : f32
      %46 = vector.broadcast %cst_24 : f32 to vector<1x32xf32>
      %47 = arith.addf %46, %39 : vector<1x32xf32>
      %48 = arith.divf %39, %47 : vector<1x32xf32>
      %49 = arith.select %41, %45, %48 : vector<1x32xi1>, vector<1x32xf32>
      %50 = tpu.concatenate %49, %49, %49, %49 in 1 : vector<1x32xf32>, vector<1x32xf32>, vector<1x32xf32>, vector<1x32xf32> -> vector<1x128xf32>
      %c0_25 = arith.constant 0 : index
      %c0_26 = arith.constant 0 : index
      %51 = vector.load %arg9[%c0_25, %c0_26] : memref<1x128xf32, #tpu.memory_space<vmem>>, vector<1x128xf32>
      tpu.vector_store %arg9[%c0_25, %c0_26], %50 {strides = array<i32>} : memref<1x128xf32, #tpu.memory_space<vmem>>, vector<1x128xf32>,
    } else {
    }
    %c1_i32 = arith.constant 1 : i32
    %13 = arith.cmpi eq, %arg0, %c1_i32 : i32
    %14 = arith.extui %13 : i1 to i32
    %c0_i32_7 = arith.constant 0 : i32
    %15 = arith.cmpi ne, %14, %c0_i32_7 : i32
    scf.if %15 {
      %c0 = arith.constant 0 : index
      %c0_8 = arith.constant 0 : index
      %16 = vector.load %arg2[%c0, %c0_8] : memref<2x128xf32, #tpu.memory_space<vmem>>, vector<2x128xf32>
      %c0_9 = arith.constant 0 : index
      %c0_10 = arith.constant 0 : index
      %17 = vector.load %arg9[%c0_9, %c0_10] : memref<1x128xf32, #tpu.memory_space<vmem>>, vector<1x128xf32>
      %18 = vector.broadcast %17 : vector<1x128xf32> to vector<2x128xf32>
      %19 = arith.mulf %16, %18 : vector<2x128xf32>
      %c0_11 = arith.constant 0 : index
      %c0_12 = arith.constant 0 : index
      %20 = vector.load %arg7[%c0_11, %c0_12] : memref<2x128xf32, #tpu.memory_space<vmem>>, vector<2x128xf32>
      tpu.vector_store %arg7[%c0_11, %c0_12], %19 {strides = array<i32>} : memref<2x128xf32, #tpu.memory_space<vmem>>, vector<2x128xf32>,
    } else {
    }
    return
  }
  func.func @transform_0(%arg0: i32, %arg1: i32) -> (i32, i32) {
    %c0_i32 = arith.constant 0 : i32
    %c0_i32_0 = arith.constant 0 : i32
    return %arg1, %c0_i32 : i32, i32
  }
  func.func @transform_1(%arg0: i32, %arg1: i32) -> (i32, i32) {
    %c0_i32 = arith.constant 0 : i32
    %c0_i32_0 = arith.constant 0 : i32
    %c0_i32_1 = arith.constant 0 : i32
    return %c0_i32, %c0_i32_0 : i32, i32
  }
  func.func @transform_2(%arg0: i32, %arg1: i32) -> (i32, i32) {
    %c0_i32 = arith.constant 0 : i32
    %c0_i32_0 = arith.constant 0 : i32
    %c0_i32_1 = arith.constant 0 : i32
    return %c0_i32, %c0_i32_0 : i32, i32
  }
  func.func @transform_3(%arg0: i32, %arg1: i32) -> (i32, i32) {
    %c0_i32 = arith.constant 0 : i32
    %c0_i32_0 = arith.constant 0 : i32
    %c0_i32_1 = arith.constant 0 : i32
    return %c0_i32, %c0_i32_0 : i32, i32
  }
  func.func @transform_4(%arg0: i32, %arg1: i32) -> (i32, i32) {
    %c0_i32 = arith.constant 0 : i32
    %c0_i32_0 = arith.constant 0 : i32
    %c0_i32_1 = arith.constant 0 : i32
    return %c0_i32, %c0_i32_0 : i32, i32
  }
  func.func @transform_5(%arg0: i32, %arg1: i32) -> (i32, i32) {
    %0 = arith.muli %arg1, %arg0 : i32
    %c0_i32 = arith.constant 0 : i32
    %c0_i32_0 = arith.constant 0 : i32
    return %0, %c0_i32 : i32, i32
  }
}

</mosaic_0001>

<bundles_post_ra>
// kernel: se_block.1
= control target key start
LH: loop header
LB: loop body
LE: loop exit
PB: predicated region body
PF: predicated region fallthrough
CT: control target
= control target key end

     0   :  { %10 = vsyncpa [#allocation5], 0  ;;  %s981_s0 = inlined_call_operand.vmem [shape: f32[2,128], index: 0, kind: input, shape index: {}]   ;;  %s982_s1 = inlined_call_operand.hbm [shape: f32[32,32], index: 1, kind: input, shape index: {}]   ;;  %s983_s2 = inlined_call_operand.vmem [shape: f32[1,32], index: 2, kind: input, shape index: {}]   ;;  %s984_s3 = inlined_call_operand.hbm [shape: f32[32,32], index: 3, kind: input, shape index: {}]   ;;  %s985_s4 = inlined_call_operand.vmem [shape: f32[1,32], index: 4, kind: input, shape index: {}]   ;;  %s986_s5 = inlined_call_operand.vmem [shape: f32[2,128], index: 5, kind: output, shape index: {}]  }
   0x1   :  { %11 = vsyncpa [#allocation7], 0  ;;  %s845_s18 = smov 0   ;;  %s847_s19 = smov 0  }
   0x2   :  { %s849_s20 = smov 0  }
   0x3 LB: > { %s594_s21 = sadd.s32 4294967295, %s802_s20   ;;  %s29_s22 = sadd.s32 1, %s798_s19  ;;  %s802_s20 = sphi %s849_s20, %s17_s20   ;;  %s798_s19 = sphi %s847_s19, %s996_s19   ;;  %s794_s18 = sphi %s845_s18, %s995_s18  }
   0x4   : > { %p31_p0 = scmp.ge.s32.totalorder %s29_s22, 2  ;;  %p596_p1 = scmp.ge.s32.totalorder %s802_s20, 1 }
   0x5   : > { %p172_p2 = scmp.lt.s32.totalorder %s802_s20, 3  ;;  %p870_p4 = scmp.eq.s32.totalorder %s594_s21, 0 }
   0x6   : > { %s998_s22 = smov (%p31_p0, %s29_s22), 0  ;;  %s804_s25 = smov [#allocation4]  }
   0x7   : > { %p866_p3 = pnand %p596_p1, %p172_p2  ;;  %s191_s26 = sshll.u32 %s804_s25, 4  ;;  %s192_s26 = int_to_ptr.vmem [resolvable:$true] %s191_s26 }
   0x8   : > { %s991_s24 = scalar_select %p870_p4, 1, 0 }
   0x9   : > { %s990_s23 = scalar_select %p866_p3, 1, 0 }
   0xa   : > { %p666_p5 = pneg %p866_p3  ;;  %s805_s28 = smov [#allocation6]  }
   0xb   : > { %s207_s29 = sshll.u32 %s805_s28, 4  ;;  %s716_s7 = scalar_lea.hbm %s982_s1, 512  ;;  %s882_s29 = int_to_ptr.vmem [resolvable:$true] %s207_s29 }
   0xc   : > { %p878_p6 = pnand %p870_p4, %p666_p5  ;;  %p717_p7 = scmp.ne.s32.totalorder %s982_s1, %s716_s7 }
   0xd   : > { %p723_p11 = scmp.lt.u32.totalorder %s716_s7, %s982_s1 }
   0xe   : > { %p718_p8 = pneg %p878_p6 }
  0x10   : > { %p719_p9 = pnand %p718_p8, %p717_p7 }
  0x12   : > { %p720_p10 = pneg %p719_p9 }
  0x14   : > { %p725_p12 = pnand %p723_p11, %p720_p10 }
  0x16   : > { %728 = shalt.err (!%p725_p12)
}
  0x17   : > { %s729_s12 = scalar_lea.vmem %s192_s26, 512  ;;  %p737_p2 = scmp.lt.s32.totalorder %s192_s26, %s192_s26 }
  0x18   : > { %p730_p13 = scmp.ne.s32.totalorder %s192_s26, %s729_s12  ;;  %p738_p5 = scmp.lt.s32.totalorder %s729_s12, %s729_s12 }
  0x1a   : > { %p732_p0 = pnand %p730_p13, %p718_p8  ;;  %p739_p4 = por %p738_p5, %p737_p2 }
  0x1c   : > { %p733_p1 = pneg %p732_p0 }
  0x1e   : > { %p740_p3 = pnand %p739_p4, %p733_p1 }
  0x20   : > { %743 = shalt.err (!%p740_p3)
}
  0x21   : > { %s806_s13 = smov 128   ;;  %s807_s14 = smov 8  }
  0x22   : > { %669 = dma.hbm_to_vmem [thread:$0]  (!%p878_p6), %s982_s1, 512, %s192_s26, [#allocation5], %s806_s13, %s806_s13, %s807_s14  }
  0x23   : > { %s744_s25 = scalar_lea.hbm %s984_s3, 512 }
  0x24   : > { %p745_p7 = scmp.ne.s32.totalorder %s984_s3, %s744_s25  ;;  %p751_p9 = scmp.lt.u32.totalorder %s744_s25, %s984_s3 }
  0x26   : > { %p747_p3 = pnand %p745_p7, %p718_p8 }
  0x28   : > { %p748_p4 = pneg %p747_p3 }
  0x2a   : > { %p753_p10 = pnand %p751_p9, %p748_p4 }
  0x2c   : > { %756 = shalt.err (!%p753_p10)
}
  0x2d   : > { %s757_s26 = scalar_lea.vmem %s882_s29, 512  ;;  %p765_p0 = scmp.lt.s32.totalorder %s882_s29, %s882_s29 }
  0x2e   : > { %p758_p11 = scmp.ne.s32.totalorder %s882_s29, %s757_s26  ;;  %p766_p1 = scmp.lt.s32.totalorder %s757_s26, %s757_s26 }
  0x30   : > { %p760_p12 = pnand %p758_p11, %p718_p8  ;;  %p767_p2 = por %p766_p1, %p765_p0 }
  0x32   : > { %p761_p13 = pneg %p760_p12 }
  0x34   : > { %p768_p5 = pnand %p767_p2, %p761_p13 }
  0x36   : > { %771 = shalt.err (!%p768_p5)
}
  0x37   : > { %672 = dma.hbm_to_vmem [thread:$0]  (!%p878_p6), %s984_s3, 512, %s882_s29, [#allocation7], %s806_s13, %s806_s13, %s807_s14  }
  0x38   : > { %p993_p7 = scmp.ne.s32.totalorder %s990_s23, 0 }
  0x39   : > { %p994_p3 = scmp.ne.s32.totalorder (!%p993_p7), %s991_s24, 0 }
  0x3a   : > { %226 = sbr.rel (%p993_p7) target bundleno = 821 (0x335), region = 40 }
  0x41   : > { %785 = dma.done.wait (%p994_p3), [#allocation5], 512  }
  0x42   : > { %787 = vsyncadd (%p994_p3), [#allocation5], 4294966784 }
  0x43   : > { %789 = dma.done.wait (%p994_p3), [#allocation7], 512  }
  0x44   : > { %791 = vsyncadd (%p994_p3), [#allocation7], 4294966784  ;;  %p267_p8 = scmp.eq.s32.totalorder %s794_s18, 0 }
  0x45   : > { %v808_v0 = vmov (%p267_p8), 0.0  }
  0x46   : > { %272 = sbr.rel (!%p267_p8) target bundleno = 77 (0x4d), region = 52  ;;  %273 = vst [vmem:[#allocation2] sm:$0x1] (%p267_p8), %v808_v0 }
  0x4d PF: > { %p604_p6 = scmp.ne.s32.totalorder %s794_s18, 0 }
  0x4e   : > { %v277_v1 = vld [vmem:[%s981_s0] sm:$0x3] (!%p604_p6)  ;;  %vm279_vm0 = vcmask (!%p604_p6), 1041408  }
  0x4f   : > { %276 = sbr.rel (%p604_p6) target bundleno = 95 (0x5f), region = 56  ;;  %v280_v2 = vsel (!%p604_p6), %vm279_vm0, %v277_v1, 0.0  ;;  %v278_v8 = vld [vmem:[#allocation2] sm:$0x1] (!%p604_p6) }
  0x50   : > { %v281_v3 = vrot.slane (!%p604_p6), %v280_v2, 4 }
  0x52   : > { %v282_v4 = vadd.f32 (!%p604_p6), %v281_v3, %v280_v2 }
  0x54   : > { %v283_v5 = vrot.slane (!%p604_p6), %v282_v4, 2 }
  0x56   : > { %v284_v6 = vadd.f32 %v283_v5, %v282_v4 }
  0x58   : > { %v285_v7 = vrot.slane %v284_v6, 1 }
  0x5a   : > { %v286_v9 = vadd.f32 %v285_v7, %v284_v6 }
  0x5c   : > { %v287_v10 = vadd.f32 %v286_v9, %v278_v8 }
  0x5e   : > { %288 = vst [vmem:[#allocation2] sm:$0x1] %v287_v10 }
  0x5f PF: > { %290 = sbr.rel (!%p267_p8) target bundleno = 811 (0x32b), region = 60  ;;  %v306_v12 = vld [vmem:[#allocation4] sm:$0xff] (%p267_p8)  ;;  %s809_s24 = smov (%p267_p8), 96   ;;  %v810_v13 = vmov (%p267_p8), 0.0|0.0   ;;  %v307_v14 = vld [vmem:[#allocation4 + $0x8] sm:$0xff] (%p267_p8)  ;;  %v308_v15 = vld [vmem:[#allocation4 + $0x10] sm:$0xff] (%p267_p8) }
  0x60   : > { %646 = vmatprep.subr.bf16.mxu0 (%p267_p8), %v810_v13  ;;  %v309_v16 = vld [vmem:[#allocation4 + $0x18] sm:$0xff] (%p267_p8)  ;;  %s811_s29 = smov (%p267_p8), 32   ;;  %v647_v17 = vpack.c.bf16 (%p267_p8), %v307_v14, %v306_v12  ;;  %vm812_vm1 = vmmov (%p267_p8), 0   ;;  %v813_v18 = vmov (%p267_p8), 0.0   ;;  %v386_v19 = vld [vmem:[#allocation6] sm:$0xff] (%p267_p8)  ;;  %v387_v20 = vld [vmem:[#allocation6 + $0x8] sm:$0xff] (%p267_p8)  ;;  %652 = vmatprep.subr.bf16.mxu1 (%p267_p8), %v810_v13 }
  0x61   : > { %632 = vmatprep.mubr.msk.f32.mxu0 (%p267_p8), %vm812_vm1, %v813_v18  ;;  %v653_v21 = vpack.c.bf16 (%p267_p8), %v387_v20, %v386_v19  ;;  %643 = vmatprep.mubr.msk.f32.mxu1 (%p267_p8), %vm812_vm1, %v813_v18  ;;  %v650_v22 = vpack.c.bf16 (%p267_p8), %v309_v16, %v308_v15  ;;  %s814_s10 = smov (%p267_p8), 64   ;;  %vm311_vm2 = vcmask (%p267_p8), 261120   ;;  %v388_v30 = vld [vmem:[#allocation6 + $0x10] sm:$0xff] (%p267_p8)  ;;  %v389_v31 = vld [vmem:[#allocation6 + $0x18] sm:$0xff] (%p267_p8)  ;;  %vm485_vm4 = vcmask (%p267_p8), 523264  }
  0x62   : > { %648 = vmatpush3.bf16.msra.mxu0 (%p267_p8), %v647_v17  ;;  %v656_v32 = vpack.c.bf16 (%p267_p8), %v389_v31, %v388_v30  ;;  %v310_v33 = vld [vmem:[%s983_s2] sm:$0x1] (%p267_p8)  ;;  %vm487_vm5 = vcmask (%p267_p8), 785408  }
  0x63   : > { %649 = vmatprep.subr.bf16.mxu0 (%p267_p8), %v810_v13  ;;  %654 = vmatpush3.bf16.msra.mxu1 (%p267_p8), %v653_v21  ;;  %v390_v38 = vld [vmem:[%s985_s4] sm:$0x1] (%p267_p8) }
  0x64   : > { %655 = vmatprep.subr.bf16.mxu1 (%p267_p8), %v810_v13 }
  0x65   : > { %v291_v11 = vld [vmem:[#allocation2] sm:$0x1] (%p267_p8) }
  0x66   : > { %293 = vrot.lane.b32.xlu0 %v291_v11, %s809_s24  ;;  %301 = vrot.lane.b32.xlu1 %v291_v11, %s811_s29 }
  0x67   : > { %651 = vmatpush3.bf16.msra.mxu0 %v650_v22  ;;  %657 = vmatpush3.bf16.msra.mxu1 %v656_v32 }
  0x6a   : > { %297 = vrot.lane.b32.xlu0 %v291_v11, %s814_s10 }
  0xd8   : > { %v294_v23 = vpop.permute.xlu0 %293  ;;  %v302_v26 = vpop.permute.xlu1 %301 }
  0xd9   : > { %v296_v24 = vadd.f32 %v294_v23, %v291_v11 }
  0xdc   : > { %v298_v25 = vpop.permute.xlu0 %297 }
  0xdd   : > { %v300_v27 = vadd.f32 %v298_v25, %v296_v24 }
  0xdf   : > { %v304_v28 = vadd.f32 %v302_v26, %v300_v27 }
  0xe1   : > { %v305_v29 = vmul.f32 0.125, %v304_v28 }
  0xe3   : > { %633 = vmatmul.mubr.msk.f32.vlgmr.msra.gmra.mrb[0].mxu0 %vm311_vm2, %v305_v29 }
 0x1b6   : > { %v381_v34 = vpop.f32.mrb[0].mxu0 }
 0x1b7   : > { %v382_v35 = vadd.f32 %v381_v34, %v310_v33  ;;  %v634_v36 = vpop.f32.mrb[1].mxu0 }
 0x1b9   : > { %v385_v37 = vmax.f32 %v382_v35, 0.0 }
 0x1bb   : > { %644 = vmatmul.mubr.msk.f32.vlgmr.msra.gmra.mrb[0].mxu1 %vm311_vm2, %v385_v37 }
 0x28e   : > { %v460_v39 = vpop.f32.mrb[0].mxu1 }
 0x28f   : > { %v461_v40 = vadd.f32 %v460_v39, %v390_v38  ;;  %v645_v41 = vpop.f32.mrb[1].mxu1 }
 0x291   : > { %v464_v42 = vand.u32 2147483647, %v461_v40  ;;  %vm468_vm3 = vcmp.ge.f32.partialorder %v461_v40, 0.0 }
 0x293   : > { %v465_v43 = vsub.f32 0.0, %v464_v42 }
 0x295   : > { %v466_v44 = vmul.f32 1.442695, %v465_v43 }
 0x297   : > { %712 = vpow2.f32 %v466_v44 }
 0x2a1   : > { %v713_v45 = vpop.eup %712 }
 0x2a2   : > { %v469_v46 = vadd.f32 1.0, %v713_v45 }
 0x2a4   : > { %714 = vrcp.f32 %v469_v46 }
 0x2ae   : > { %v715_v47 = vpop.eup %714 }
 0x2af   : > { %v472_v48 = vmul.f32 %v715_v47, %v713_v45 }
 0x2b1   : > { %v473_v49 = vsel %vm468_vm3, %v715_v47, %v472_v48 }
 0x2b2   : > { %478 = vrot.lane.b32.xlu0 %v473_v49, %s814_s10  ;;  %475 = vrot.lane.b32.xlu1 %v473_v49, %s811_s29 }
 0x2b6   : > { %481 = vrot.lane.b32.xlu1 %v473_v49, %s809_s24 }
 0x324   : > { %v476_v50 = vpop.permute.xlu1 %475  ;;  %v479_v51 = vpop.permute.xlu0 %478 }
 0x325   : > { %v484_v52 = vsel %vm311_vm2, %v473_v49, %v476_v50 }
 0x326   : > { %v486_v53 = vsel %vm485_vm4, %v484_v52, %v479_v51 }
 0x328   : > { %v482_v54 = vpop.permute.xlu1 %481 }
 0x329   : > { %v488_v55 = vsel %vm487_vm5, %v486_v53, %v482_v54 }
 0x32a   : > { %489 = vst [vmem:[#allocation3] sm:$0x1] %v488_v55 }
 0x32b PF: > { %p607_p4 = scmp.ne.s32.totalorder %s794_s18, 1 }
 0x32c   : > { %v494_v56 = vld [vmem:[%s981_s0] sm:$0x3] (!%p607_p4) }
 0x32d   : > { %493 = sbr.rel (%p607_p4) target bundleno = 821 (0x335), region = 64 }
 0x331   : > { %v608_v57 = vld [vmem:[#allocation3] ss:$0 sm:$0xff] (!%p607_p4) }
 0x332   : > { %v502_v58 = vmul.f32 (!%p607_p4), %v608_v57, %v494_v56 }
 0x334   : > { %503 = vst [vmem:[%s986_s5] sm:$0x3] %v502_v58 }
 0x335 PF: > { %s17_s20 = sadd.s32 1, %s802_s20   ;;  %s995_s18 = smov %s798_s19 }
 0x336   : > { %p14_p9 = scmp.ge.s32.totalorder %s17_s20, 4   ;;  %s996_s19 = smov %s998_s22 }
 0x338   :  { %16 = sbr.rel (!%p14_p9) target bundleno = 3 (0x3), region = 95 }
 0x33f   :  { %526 = vsyncpa [#allocation5], 1 }
 0x340   :  { %528 = vsyncpa [#allocation5 + $0x1], 1 }
 0x341   :  { %529 = vsyncpa [#allocation7], 1 }

</bundles_post_ra>
